<compile_context>
chip_gen: v6e
topology: v6e:2x2x1
jax: 0.10.0
libtpu: 0.0.40
codegen_flags: <defaults>
</compile_context>

<pallas_src>
import jax
import jax.numpy as jnp
from jax.experimental import pallas as pl
from jax.experimental.pallas import tpu as pltpu

_EPS = 1e-5
_NEG = -1e30          # logit mask value for padded output columns
_LANE = 128


def _round_up(n, m):
    return (n + m - 1) // m * m


# --------------------------------------------------------------------------- #
# Kernel
# --------------------------------------------------------------------------- #
def _make_cfgen_kernel(dout):
    """dout is static (number of valid output columns stored)."""

    def kernel(z_ref, c_ref, w1z_ref, vec_ref, w23_ref, o_ref):
        f32 = jnp.float32
        bf16 = jnp.bfloat16

        c = c_ref[...]                                   # (B, 1) f32

        # Stacked per-feature vectors: one (8, P) f32 slab, static row slices.
        b1  = vec_ref[0:1, :]    # effective Linear-1 bias (b1 + emb1 @ W1e)
        dv  = vec_ref[1:2, :]    # rank-1 direction (emb0 - emb1) @ W1e
        g1  = vec_ref[2:3, :]
        be1 = vec_ref[3:4, :]
        b2  = vec_ref[4:5, :]
        g2  = vec_ref[5:6, :]
        be2 = vec_ref[6:7, :]
        b3  = vec_ref[7:8, :]    # padded cols carry -1e30 (softmax mask)

        # ---- Linear 1: concat folded into W1z; embedding path is a rank-1 FMA
        #   h = z @ W1z + (b1 + emb1@W1e) + c * (emb0@W1e - emb1@W1e)
        h = jnp.dot(z_ref[...].astype(bf16), w1z_ref[...],
                    preferred_element_type=f32)          # (B, P)
        h = h + b1 + c * dv

        # ---- BatchNorm1d (training mode, biased variance) — single-pass stats
        mu = jnp.mean(h, axis=0, keepdims=True)
        var = jnp.mean(h * h, axis=0, keepdims=True) - mu * mu
        h = (h - mu) * jax.lax.rsqrt(var + _EPS) * g1 + be1

        # ---- Linear 2 (bf16 MXU feed, f32 accumulate) ----
        h = jnp.dot(h.astype(bf16), w23_ref[0], preferred_element_type=f32) + b2

        # ---- BatchNorm1d — single-pass stats ----
        mu = jnp.mean(h, axis=0, keepdims=True)
        var = jnp.mean(h * h, axis=0, keepdims=True) - mu * mu
        h = (h - mu) * jax.lax.rsqrt(var + _EPS) * g2 + be2

        # ---- Linear 3 ----
        h = jnp.dot(h.astype(bf16), w23_ref[1], preferred_element_type=f32) + b3

        # ---- Softmax over dim=1 (padded cols have -1e30 bias -> exp == 0) ----
        m = jnp.max(h, axis=1, keepdims=True)
        e = jnp.exp(h - m)
        s = jnp.sum(e, axis=1, keepdims=True)
        sm = e / s                                        # exact: rows sum to 1

        # Store only the valid output columns (masked store, no wrapper slice).
        o_ref[...] = sm[:, :dout].astype(o_ref.dtype)

    return kernel


# --------------------------------------------------------------------------- #
# One-time parameter preparation (hoisted out of the per-call hot path)
# --------------------------------------------------------------------------- #
def prepare_params(params, input_dim):
    f32, bf16 = jnp.float32, jnp.bfloat16
    emb = params["emb"].astype(f32)                  # (2, 8)
    w1, b1 = params["w1"].astype(f32), params["b1"].astype(f32)
    g1, be1 = params["g1"].astype(f32), params["be1"].astype(f32)
    w2, b2 = params["w2"].astype(f32), params["b2"].astype(f32)
    g2, be2 = params["g2"].astype(f32), params["be2"].astype(f32)
    w3, b3 = params["w3"].astype(f32), params["b3"].astype(f32)

    din = input_dim
    h1, h2, dout = w1.shape[0], w2.shape[0], w3.shape[0]
    # One uniform padded feature width (multiple of 128 lanes) for all layers.
    P = max(_round_up(d, _LANE) for d in (h1, h2, dout))

    # Split W1 into z-part / embedding-part; fold embedding into rank-1 terms.
    w1z = w1[:, :din].T                              # (Din, H1)
    w1e = w1[:, din:].T                              # (8,  H1)
    v0 = emb[0:1, :] @ w1e                           # (1, H1)
    v1 = emb[1:2, :] @ w1e                           # (1, H1)
    bias1 = b1[None, :] + v1                         # (1, H1)  effective bias
    dv = v0 - v1                                     # (1, H1)  rank-1 direction

    def padv(x, val=0.0):
        return jnp.pad(x, ((0, 0), (0, P - x.shape[1])), constant_values=val)

    # Stack all eight (1,P) vectors into one (8,P) f32 slab (single operand/DMA).
    vecs = jnp.concatenate(
        [padv(bias1), padv(dv), padv(g1[None]), padv(be1[None]),
         padv(b2[None]), padv(g2[None]), padv(be2[None]),
         padv(b3[None], val=_NEG)],                  # mask padded logits
        axis=0).astype(f32)                          # (8, P)

    # Stack W2/W3 into one (2,P,P) bf16 slab (single operand/DMA).
    w2p = jnp.pad(w2.T, ((0, P - h1), (0, P - h2)))
    w3p = jnp.pad(w3.T, ((0, P - h2), (0, P - dout)))
    w23 = jnp.stack([w2p, w3p], axis=0).astype(bf16)  # (2, P, P)

    w1zp = jnp.pad(w1z, ((0, 0), (0, P - h1))).astype(bf16)   # (Din, P)

    return {"w1z": w1zp, "vecs": vecs, "w23": w23, "dout": dout, "P": P}


# --------------------------------------------------------------------------- #
# Forward wrapper
# --------------------------------------------------------------------------- #
def condition_feature_generation_block(z, c, prepped):
    """z: (B, input_dim) f32, c: (B,) or (B,1). Returns (B, output_dim) f32."""
    B = z.shape[0]
    # Metadata-only reshape; the real cast (z -> bf16) happens inside the kernel.
    c = c.reshape(-1, 1).astype(jnp.float32)
    z = z.astype(jnp.float32)

    args = (z, c, prepped["w1z"], prepped["vecs"], prepped["w23"])

    vmem = pl.BlockSpec(memory_space=pltpu.MemorySpace.VMEM)
    out = pl.pallas_call(
        _make_cfgen_kernel(prepped["dout"]),
        out_shape=jax.ShapeDtypeStruct((B, prepped["dout"]), jnp.float32),
        in_specs=[vmem] * len(args),
        out_specs=vmem,
    )(*args)
    return out


# --------------------------------------------------------------------------- #
# Init + references
# --------------------------------------------------------------------------- #
def _init_params(key, input_dim, output_dim):
    """Deterministic init mirroring the PyTorch module's shapes/defaults."""
    dim_diff = output_dim // input_dim
    h1 = input_dim * dim_diff // 3
    h2 = h1 * 2

    def lin(key, fan_in, fan_out):
        kw, kb = jax.random.split(key)
        bound = 1.0 / jnp.sqrt(fan_in)
        w = jax.random.uniform(kw, (fan_out, fan_in), jnp.float32, -bound, bound)
        b = jax.random.uniform(kb, (fan_out,), jnp.float32, -bound, bound)
        return w, b

    k_emb, k1, k2, k3 = jax.random.split(key, 4)
    emb = jax.random.normal(k_emb, (2, 8), jnp.float32)      # nn.Embedding(2, 8)
    w1, b1 = lin(k1, input_dim + 8, h1)
    w2, b2 = lin(k2, h1, h2)
    w3, b3 = lin(k3, h2, output_dim)
    return {
        "emb": emb,
        "w1": w1, "b1": b1, "g1": jnp.ones((h1,), jnp.float32), "be1": jnp.zeros((h1,), jnp.float32),
        "w2": w2, "b2": b2, "g2": jnp.ones((h2,), jnp.float32), "be2": jnp.zeros((h2,), jnp.float32),
        "w3": w3, "b3": b3,
    }


def _bn(x, g, b):
    mu = jnp.mean(x, axis=0, keepdims=True)
    var = jnp.mean((x - mu) ** 2, axis=0, keepdims=True)
    return (x - mu) / jnp.sqrt(var + _EPS) * g + b


def _reference_f32(z, c, p):
    """Pure-f32 reference matching the PyTorch module exactly."""
    c = c.reshape(-1, 1)
    we = c * p["emb"][0] + (1.0 - c) * p["emb"][1]
    x = jnp.concatenate([z, we], axis=1)
    h = _bn(x @ p["w1"].T + p["b1"], p["g1"], p["be1"])
    h = _bn(h @ p["w2"].T + p["b2"], p["g2"], p["be2"])
    h = h @ p["w3"].T + p["b3"]
    return jax.nn.softmax(h, axis=1)


def _reference_bf16(z, c, p):
    """Reference mirroring the kernel's bf16-operand / f32-accumulate matmuls."""
    f32, bf16 = jnp.float32, jnp.bfloat16
    din = z.shape[1]
    c = c.reshape(-1, 1).astype(f32)
    w1z, w1e = p["w1"][:, :din].T, p["w1"][:, din:].T
    v0, v1 = p["emb"][0:1] @ w1e, p["emb"][1:2] @ w1e
    h = jnp.dot(z.astype(bf16), w1z.astype(bf16), preferred_element_type=f32)
    h = h + (p["b1"][None] + v1) + c * (v0 - v1)
    h = _bn(h, p["g1"][None], p["be1"][None])
    h = jnp.dot(h.astype(bf16), p["w2"].T.astype(bf16), preferred_element_type=f32) + p["b2"][None]
    h = _bn(h, p["g2"][None], p["be2"][None])
    h = jnp.dot(h.astype(bf16), p["w3"].T.astype(bf16), preferred_element_type=f32) + p["b3"][None]
    return jax.nn.softmax(h, axis=1)


if __name__ == "__main__":
    INPUT_DIM, OUTPUT_DIM, BATCH = 32, 96, 8   # dim_diff=3 -> H1=32, H2=64

    key = jax.random.PRNGKey(0)
    kz, kc, kp = jax.random.split(key, 3)
    z = jax.random.normal(kz, (BATCH, INPUT_DIM), jnp.float32)
    c = jax.random.uniform(kc, (BATCH,), jnp.float32)          # per-sample label weight
    params = _init_params(kp, INPUT_DIM, OUTPUT_DIM)

    prepped = prepare_params(params, INPUT_DIM)                # one-time weight prep

    out = condition_feature_generation_block(z, c, prepped)
    out = jax.block_until_ready(out)

    ref_bf16 = jax.block_until_ready(_reference_bf16(z, c, params))
    ref_f32 = jax.block_until_ready(_reference_f32(z, c, params))

    assert out.shape == (BATCH, OUTPUT_DIM)
    # Tight check vs. an identically-quantized (bf16-matmul) reference.
    assert jnp.allclose(out, ref_bf16, atol=2e-3, rtol=0), "mismatch vs bf16 reference"
    # Loose check vs. the exact f32 PyTorch-equivalent reference (bf16 quantization error).
    assert jnp.allclose(out, ref_f32, atol=1e-2, rtol=0), "mismatch vs f32 reference"
    # Softmax rows must sum to 1 (exact divide; no mass leaking into padded columns).
    assert jnp.allclose(jnp.sum(out, axis=1), 1.0, atol=1e-3), "softmax rows do not sum to 1"

    print("KERNEL_OK")
</pallas_src>

<mosaic_0001>
module attributes {stable_mosaic.version = 11 : i64} {
  func.func @kernel(%arg0: memref<8x32xf32, #tpu.memory_space<vmem>>, %arg1: memref<8x1xf32, #tpu.memory_space<vmem>>, %arg2: memref<32x128xbf16, #tpu.memory_space<vmem>>, %arg3: memref<8x128xf32, #tpu.memory_space<vmem>>, %arg4: memref<2x128x128xbf16, #tpu.memory_space<vmem>>, %arg5: memref<8x96xf32, #tpu.memory_space<vmem>>) attributes {dimension_semantics = [], scalar_prefetch = 0 : i64, scratch_operands = 0 : i64, tpu.core_type = #tpu.core_type<tc>} {
    %c0 = arith.constant 0 : index
    %c0_0 = arith.constant 0 : index
    %0 = vector.load %arg1[%c0, %c0_0] : memref<8x1xf32, #tpu.memory_space<vmem>>, vector<8x1xf32>
    %c0_1 = arith.constant 0 : index
    %c0_2 = arith.constant 0 : index
    %1 = vector.load %arg3[%c0_1, %c0_2] : memref<8x128xf32, #tpu.memory_space<vmem>>, vector<1x128xf32>
    %c1 = arith.constant 1 : index
    %c0_3 = arith.constant 0 : index
    %2 = vector.load %arg3[%c1, %c0_3] : memref<8x128xf32, #tpu.memory_space<vmem>>, vector<1x128xf32>
    %c2 = arith.constant 2 : index
    %c0_4 = arith.constant 0 : index
    %3 = vector.load %arg3[%c2, %c0_4] : memref<8x128xf32, #tpu.memory_space<vmem>>, vector<1x128xf32>
    %c3 = arith.constant 3 : index
    %c0_5 = arith.constant 0 : index
    %4 = vector.load %arg3[%c3, %c0_5] : memref<8x128xf32, #tpu.memory_space<vmem>>, vector<1x128xf32>
    %c4 = arith.constant 4 : index
    %c0_6 = arith.constant 0 : index
    %5 = vector.load %arg3[%c4, %c0_6] : memref<8x128xf32, #tpu.memory_space<vmem>>, vector<1x128xf32>
    %c5 = arith.constant 5 : index
    %c0_7 = arith.constant 0 : index
    %6 = vector.load %arg3[%c5, %c0_7] : memref<8x128xf32, #tpu.memory_space<vmem>>, vector<1x128xf32>
    %c6 = arith.constant 6 : index
    %c0_8 = arith.constant 0 : index
    %7 = vector.load %arg3[%c6, %c0_8] : memref<8x128xf32, #tpu.memory_space<vmem>>, vector<1x128xf32>
    %c7 = arith.constant 7 : index
    %c0_9 = arith.constant 0 : index
    %8 = vector.load %arg3[%c7, %c0_9] : memref<8x128xf32, #tpu.memory_space<vmem>>, vector<1x128xf32>
    %c0_10 = arith.constant 0 : index
    %c0_11 = arith.constant 0 : index
    %9 = vector.load %arg0[%c0_10, %c0_11] : memref<8x32xf32, #tpu.memory_space<vmem>>, vector<8x32xf32>
    %10 = arith.truncf %9 : vector<8x32xf32> to vector<8x32xbf16>
    %c0_12 = arith.constant 0 : index
    %c0_13 = arith.constant 0 : index
    %11 = vector.load %arg2[%c0_12, %c0_13] : memref<32x128xbf16, #tpu.memory_space<vmem>>, vector<32x128xbf16>
    %cst = arith.constant dense<0.000000e+00> : vector<8x128xf32>
    %12 = tpu.matmul %10, %11, %cst {dimension_numbers = #tpu.dot_dimension_numbers<[1], [0], [0], [1], [0, 0, 1, 1], [], []>} : vector<8x32xbf16>, vector<32x128xbf16>, vector<8x128xf32> -> vector<8x128xf32>
    %13 = vector.broadcast %1 : vector<1x128xf32> to vector<8x128xf32>
    %14 = arith.addf %12, %13 : vector<8x128xf32>
    %15 = vector.broadcast %0 : vector<8x1xf32> to vector<8x128xf32>
    %16 = vector.broadcast %2 : vector<1x128xf32> to vector<8x128xf32>
    %17 = arith.mulf %15, %16 : vector<8x128xf32>
    %18 = arith.addf %14, %17 : vector<8x128xf32>
    %cst_14 = arith.constant dense<0.000000e+00> : vector<128xf32>
    %19 = vector.multi_reduction <add>, %18, %cst_14 [0] : vector<8x128xf32> to vector<128xf32>
    %20 = vector.shape_cast %19 : vector<128xf32> to vector<1x128xf32>
    %cst_15 = arith.constant 8.000000e+00 : f32
    %21 = vector.broadcast %cst_15 : f32 to vector<1x128xf32>
    %22 = arith.divf %20, %21 : vector<1x128xf32>
    %23 = arith.mulf %18, %18 : vector<8x128xf32>
    %cst_16 = arith.constant dense<0.000000e+00> : vector<128xf32>
    %24 = vector.multi_reduction <add>, %23, %cst_16 [0] : vector<8x128xf32> to vector<128xf32>
    %25 = vector.shape_cast %24 : vector<128xf32> to vector<1x128xf32>
    %cst_17 = arith.constant 8.000000e+00 : f32
    %26 = vector.broadcast %cst_17 : f32 to vector<1x128xf32>
    %27 = arith.divf %25, %26 : vector<1x128xf32>
    %28 = arith.mulf %22, %22 : vector<1x128xf32>
    %29 = arith.subf %27, %28 : vector<1x128xf32>
    %30 = vector.broadcast %22 : vector<1x128xf32> to vector<8x128xf32>
    %31 = arith.subf %18, %30 : vector<8x128xf32>
    %cst_18 = arith.constant 9.99999974E-6 : f32
    %32 = vector.broadcast %cst_18 : f32 to vector<1x128xf32>
    %33 = arith.addf %29, %32 : vector<1x128xf32>
    %34 = math.rsqrt %33 : vector<1x128xf32>
    %35 = vector.broadcast %34 : vector<1x128xf32> to vector<8x128xf32>
    %36 = arith.mulf %31, %35 : vector<8x128xf32>
    %37 = vector.broadcast %3 : vector<1x128xf32> to vector<8x128xf32>
    %38 = arith.mulf %36, %37 : vector<8x128xf32>
    %39 = vector.broadcast %4 : vector<1x128xf32> to vector<8x128xf32>
    %40 = arith.addf %38, %39 : vector<8x128xf32>
    %41 = arith.truncf %40 : vector<8x128xf32> to vector<8x128xbf16>
    %c0_19 = arith.constant 0 : index
    %c0_20 = arith.constant 0 : index
    %c0_21 = arith.constant 0 : index
    %42 = vector.load %arg4[%c0_19, %c0_20, %c0_21] : memref<2x128x128xbf16, #tpu.memory_space<vmem>>, vector<1x128x128xbf16>
    %43 = vector.shape_cast %42 : vector<1x128x128xbf16> to vector<128x128xbf16>
    %cst_22 = arith.constant dense<0.000000e+00> : vector<8x128xf32>
    %44 = tpu.matmul %41, %43, %cst_22 {dimension_numbers = #tpu.dot_dimension_numbers<[1], [0], [0], [1], [0, 0, 1, 1], [], []>} : vector<8x128xbf16>, vector<128x128xbf16>, vector<8x128xf32> -> vector<8x128xf32>
    %45 = vector.broadcast %5 : vector<1x128xf32> to vector<8x128xf32>
    %46 = arith.addf %44, %45 : vector<8x128xf32>
    %cst_23 = arith.constant dense<0.000000e+00> : vector<128xf32>
    %47 = vector.multi_reduction <add>, %46, %cst_23 [0] : vector<8x128xf32> to vector<128xf32>
    %48 = vector.shape_cast %47 : vector<128xf32> to vector<1x128xf32>
    %cst_24 = arith.constant 8.000000e+00 : f32
    %49 = vector.broadcast %cst_24 : f32 to vector<1x128xf32>
    %50 = arith.divf %48, %49 : vector<1x128xf32>
    %51 = arith.mulf %46, %46 : vector<8x128xf32>
    %cst_25 = arith.constant dense<0.000000e+00> : vector<128xf32>
    %52 = vector.multi_reduction <add>, %51, %cst_25 [0] : vector<8x128xf32> to vector<128xf32>
    %53 = vector.shape_cast %52 : vector<128xf32> to vector<1x128xf32>
    %cst_26 = arith.constant 8.000000e+00 : f32
    %54 = vector.broadcast %cst_26 : f32 to vector<1x128xf32>
    %55 = arith.divf %53, %54 : vector<1x128xf32>
    %56 = arith.mulf %50, %50 : vector<1x128xf32>
    %57 = arith.subf %55, %56 : vector<1x128xf32>
    %58 = vector.broadcast %50 : vector<1x128xf32> to vector<8x128xf32>
    %59 = arith.subf %46, %58 : vector<8x128xf32>
    %cst_27 = arith.constant 9.99999974E-6 : f32
    %60 = vector.broadcast %cst_27 : f32 to vector<1x128xf32>
    %61 = arith.addf %57, %60 : vector<1x128xf32>
    %62 = math.rsqrt %61 : vector<1x128xf32>
    %63 = vector.broadcast %62 : vector<1x128xf32> to vector<8x128xf32>
    %64 = arith.mulf %59, %63 : vector<8x128xf32>
    %65 = vector.broadcast %6 : vector<1x128xf32> to vector<8x128xf32>
    %66 = arith.mulf %64, %65 : vector<8x128xf32>
    %67 = vector.broadcast %7 : vector<1x128xf32> to vector<8x128xf32>
    %68 = arith.addf %66, %67 : vector<8x128xf32>
    %69 = arith.truncf %68 : vector<8x128xf32> to vector<8x128xbf16>
    %c1_28 = arith.constant 1 : index
    %c0_29 = arith.constant 0 : index
    %c0_30 = arith.constant 0 : index
    %70 = vector.load %arg4[%c1_28, %c0_29, %c0_30] : memref<2x128x128xbf16, #tpu.memory_space<vmem>>, vector<1x128x128xbf16>
    %71 = vector.shape_cast %70 : vector<1x128x128xbf16> to vector<128x128xbf16>
    %cst_31 = arith.constant dense<0.000000e+00> : vector<8x128xf32>
    %72 = tpu.matmul %69, %71, %cst_31 {dimension_numbers = #tpu.dot_dimension_numbers<[1], [0], [0], [1], [0, 0, 1, 1], [], []>} : vector<8x128xbf16>, vector<128x128xbf16>, vector<8x128xf32> -> vector<8x128xf32>
    %73 = vector.broadcast %8 : vector<1x128xf32> to vector<8x128xf32>
    %74 = arith.addf %72, %73 : vector<8x128xf32>
    %cst_32 = arith.constant dense<0xFF800000> : vector<8xf32>
    %75 = vector.multi_reduction <maximumf>, %74, %cst_32 [1] : vector<8x128xf32> to vector<8xf32>
    %76 = vector.shape_cast %75 : vector<8xf32> to vector<8x1xf32>
    %77 = vector.broadcast %76 : vector<8x1xf32> to vector<8x128xf32>
    %78 = arith.subf %74, %77 : vector<8x128xf32>
    %79 = math.exp %78 : vector<8x128xf32>
    %cst_33 = arith.constant dense<0.000000e+00> : vector<8xf32>
    %80 = vector.multi_reduction <add>, %79, %cst_33 [1] : vector<8x128xf32> to vector<8xf32>
    %81 = vector.shape_cast %80 : vector<8xf32> to vector<8x1xf32>
    %82 = vector.broadcast %81 : vector<8x1xf32> to vector<8x128xf32>
    %83 = arith.divf %79, %82 : vector<8x128xf32>
    %84 = vector.extract_strided_slice %83 {offsets = [0, 0], sizes = [8, 96], strides = [1, 1]} : vector<8x128xf32> to vector<8x96xf32>
    %c0_34 = arith.constant 0 : index
    %c0_35 = arith.constant 0 : index
    %85 = vector.load %arg5[%c0_34, %c0_35] : memref<8x96xf32, #tpu.memory_space<vmem>>, vector<8x96xf32>
    tpu.vector_store %arg5[%c0_34, %c0_35], %84 {strides = array<i32>} : memref<8x96xf32, #tpu.memory_space<vmem>>, vector<8x96xf32>,
    return
  }
}

</mosaic_0001>

<bundles_post_ra>
// kernel: tpu_custom_call.1
= control target key start
LH: loop header
LB: loop body
LE: loop exit
PB: predicated region body
PF: predicated region fallthrough
CT: control target
= control target key end

     0   :  { %10 = vsyncpa [#allocation3], 0  ;;  %s755_s0 = inlined_call_operand.vmem [shape: f32[8,32], index: 0, kind: input, shape index: {}]   ;;  %s756_s1 = inlined_call_operand.vmem [shape: f32[8,1], index: 1, kind: input, shape index: {}]   ;;  %s757_s2 = inlined_call_operand.hbm [shape: bf16[32,128], index: 2, kind: input, shape index: {}]   ;;  %s758_s3 = inlined_call_operand.hbm [shape: f32[8,128], index: 3, kind: input, shape index: {}]   ;;  %s759_s4 = inlined_call_operand.hbm [shape: bf16[2,128,128], index: 4, kind: input, shape index: {}]   ;;  %s760_s5 = inlined_call_operand.hbm [shape: f32[8,96], index: 5, kind: output, shape index: {}]  }
   0x1   :  { %11 = vsyncpa [#allocation6], 0 }
   0x2   :  { %12 = vsyncpa [#allocation4], 0  ;;  %s674_s18 = smov [#allocation5]   ;;  %s675_s20 = smov [#allocation2]  }
   0x3   :  { %s35_s19 = sshll.u32 %s674_s18, 4  ;;  %s22_s21 = sshll.u32 %s675_s20, 4  ;;  %s36_s19 = int_to_ptr.vmem [resolvable:$true] %s35_s19  ;;  %s23_s21 = int_to_ptr.vmem [resolvable:$true] %s22_s21 }
   0x4   :  { %s596_s22 = scalar_lea.vmem %s36_s19, 128  ;;  %p601_p1 = scmp.lt.s32.totalorder %s36_s19, %s36_s19 }
   0x5   :  { %p597_p0 = scmp.ne.s32.totalorder %s36_s19, %s596_s22  ;;  %p602_p2 = scmp.lt.s32.totalorder %s596_s22, %s596_s22 }
   0x7   :  { %p603_p3 = por %p602_p2, %p601_p1 }
   0x9   :  { %p604_p4 = pnand %p603_p3, %p597_p0 }
   0xb   :  { %607 = shalt.err (!%p604_p4)
}
   0xc   :  { %38 = dma.hbm_to_vmem [thread:$0]  %s758_s3, 128, %s36_s19, [#allocation6]  }
   0xd   :  { %s616_s25 = scalar_lea.vmem %s23_s21, 256  ;;  %p621_p6 = scmp.lt.s32.totalorder %s23_s21, %s23_s21 }
   0xe   :  { %p617_p5 = scmp.ne.s32.totalorder %s23_s21, %s616_s25  ;;  %p622_p7 = scmp.lt.s32.totalorder %s616_s25, %s616_s25 }
  0x10   :  { %p623_p8 = por %p622_p7, %p621_p6 }
  0x12   :  { %p624_p9 = pnand %p623_p8, %p617_p5 }
  0x14   :  { %627 = shalt.err (!%p624_p9)
}
  0x15   :  { %s676_s26 = smov 64   ;;  %s677_s27 = smov 4  }
  0x16   :  { %28 = dma.hbm_to_vmem [thread:$0]  %s757_s2, 256, %s23_s21, [#allocation3], %s676_s26, %s676_s26, %s677_s27  }
  0x17   :  { %s678_s30 = smov [#allocation7]  }
  0x18   :  { %s44_s6 = sshll.u32 %s678_s30, 4  ;;  %s45_s6 = int_to_ptr.vmem [resolvable:$true] %s44_s6 }
  0x19   :  { %s636_s7 = scalar_lea.vmem %s45_s6, 2048  ;;  %p641_p11 = scmp.lt.s32.totalorder %s45_s6, %s45_s6 }
  0x1a   :  { %p637_p10 = scmp.ne.s32.totalorder %s45_s6, %s636_s7  ;;  %p642_p12 = scmp.lt.s32.totalorder %s636_s7, %s636_s7 }
  0x1c   :  { %p643_p13 = por %p642_p12, %p641_p11 }
  0x1e   :  { %p644_p0 = pnand %p643_p13, %p637_p10 }
  0x20   :  { %647 = shalt.err (!%p644_p0)
}
  0x21   :  { %50 = dma.hbm_to_vmem [thread:$0]  %s759_s4, 2048, %s45_s6, [#allocation6], %s676_s26, %s676_s26, %s677_s27  }
  0x22   :  { %668 = dma.done.wait [#allocation3], 256  }
  0x23   :  { %669 = vsyncadd [#allocation3], 4294967040 }
  0x24   :  { %670 = dma.done.wait [#allocation6], 2176  }
  0x25   :  { %671 = vsyncadd [#allocation6], 4294965120  ;;  %v679_v0 = vmov 0.0   ;;  %vm680_vm0 = vmmov 0   ;;  %v681_v1 = vmov 0   ;;  %v562_v2 = vld [vmem:[#allocation2 + $0x8] sm:$0xff]  }
  0x26   :  { %504 = vmatprep.subr.bf16.mxu0 %v679_v0  ;;  %508 = vmatprep.mubr.msk.bf16.mxu0 %vm680_vm0, %v679_v0  ;;  %v563_v3 = vld [vmem:[#allocation2] sm:$0xff]   ;;  %vm92_vm1 = vcmask 261120   ;;  %v564_v7 = vld [vmem:[#allocation7 + $0x38] sm:$0xff]   ;;  %v565_v8 = vld [vmem:[#allocation7 + $0x30] sm:$0xff]   ;;  %vm438_vm2 = vcmask 785408  }
  0x27   :  { %561 = vset.pattern.permute.xlu0 %v681_v1  ;;  %512 = vmatprep.subr.bf16.mxu1 %v679_v0  ;;  %v70_v4 = vld [vmem:[%s755_s0] sm:$0xff]  ;;  %v567_v10 = vld [vmem:[#allocation7 + $0x20] sm:$0xff]   ;;  %v568_v11 = vld [vmem:[#allocation7 + $0x18] sm:$0xff]   ;;  %s682_s0 = smov [#allocation8]  }
  0x28   :  { %528 = vmatprep.mubr.msk.bf16.mxu1 %vm680_vm0, %v679_v0  ;;  %505 = vmatpush3.bf16.msra.mxu0 %v562_v2  ;;  %v61_v5 = vld [vmem:[%s756_s1] sm:$0xff]  ;;  %v71_v6 = vpack.c.bf16 %v70_v4, %v70_v4  ;;  %v569_v12 = vld [vmem:[#allocation7 + $0x10] sm:$0xff]   ;;  %v571_v14 = vld [vmem:[#allocation7] sm:$0xff]   ;;  %s446_s1 = sshll.u32 %s682_s0, 4  ;;  %s447_s1 = int_to_ptr.vmem [resolvable:$true] %s446_s1 }
  0x29   :  { %506 = vmatprep.subr.bf16.mxu0 %v679_v0  ;;  %138 = vperm.xlu0 %561, %v61_v5   ;;  %v566_v9 = vld [vmem:[#allocation7 + $0x28] sm:$0xff]   ;;  %v460_v15 = vld [vmem:[#allocation5 + $0x1] ss:$0 sm:$0xff]  ;;  %v456_v17 = vld [vmem:[#allocation5] ss:$0 sm:$0xff]  ;;  %s648_s11 = scalar_lea.vmem %s447_s1, 128  ;;  %p653_p2 = scmp.lt.s32.totalorder %s447_s1, %s447_s1 }
  0x2a   :  { %513 = vmatpush3.bf16.msra.mxu1 %v564_v7  ;;  %v570_v13 = vld [vmem:[#allocation7 + $0x8] sm:$0xff]   ;;  %v461_v45 = vld [vmem:[#allocation5 + $0x2] ss:$0 sm:$0xff]  ;;  %v462_v47 = vld [vmem:[#allocation5 + $0x3] ss:$0 sm:$0xff]  ;;  %p649_p1 = scmp.ne.s32.totalorder %s447_s1, %s648_s11  ;;  %p654_p3 = scmp.lt.s32.totalorder %s648_s11, %s648_s11 }
  0x2b   :  { %514 = vmatprep.subr.bf16.mxu1 %v679_v0  ;;  %v572_v51 = vld [vmem:[#allocation7 + $0x78] sm:$0xff]   ;;  %v573_v52 = vld [vmem:[#allocation7 + $0x70] sm:$0xff]   ;;  %v574_v53 = vld [vmem:[#allocation7 + $0x68] sm:$0xff]  }
  0x2c   :  { %507 = vmatpush3.bf16.msra.mxu0 %v563_v3  ;;  %v575_v54 = vld [vmem:[#allocation7 + $0x60] sm:$0xff]   ;;  %v576_v55 = vld [vmem:[#allocation7 + $0x58] sm:$0xff]   ;;  %v577_v56 = vld [vmem:[#allocation7 + $0x50] sm:$0xff]   ;;  %p655_p4 = por %p654_p3, %p653_p2 }
  0x2d   :  { %532 = vmatprep.subr.bf16.mxu0 %v679_v0  ;;  %v578_v57 = vld [vmem:[#allocation7 + $0x48] sm:$0xff]   ;;  %v579_v58 = vld [vmem:[#allocation7 + $0x40] sm:$0xff]   ;;  %v463_v59 = vld [vmem:[#allocation5 + $0x4] ss:$0 sm:$0xff] }
  0x2e   :  { %515 = vmatpush3.bf16.msra.mxu1 %v565_v8  ;;  %p656_p5 = pnand %p655_p4, %p649_p1 }
  0x2f   :  { %509 = vmatmul.mubr.msk.bf16.vlgmr.msra.gmra.mxu0 %vm92_vm1, %v71_v6  ;;  %516 = vmatprep.subr.bf16.mxu1 %v679_v0 }
  0x30   :  { %548 = vmatprep.mubr.msk.bf16.mxu0 %vm680_vm0, %v679_v0  ;;  %533 = vmatpush3.bf16.msra.mxu0 %v572_v51 }
  0x31   :  { %534 = vmatprep.subr.bf16.mxu0 %v679_v0 }
  0x32   :  { %517 = vmatpush3.bf16.msra.mxu1 %v566_v9 }
  0x33   :  { %518 = vmatprep.subr.bf16.mxu1 %v679_v0 }
  0x34   :  { %535 = vmatpush3.bf16.msra.mxu0 %v573_v52 }
  0x35   :  { %536 = vmatprep.subr.bf16.mxu0 %v679_v0 }
  0x36   :  { %519 = vmatpush3.bf16.msra.mxu1 %v567_v10 }
  0x37   :  { %520 = vmatprep.subr.bf16.mxu1 %v679_v0 }
  0x38   :  { %537 = vmatpush3.bf16.msra.mxu0 %v574_v53 }
  0x39   :  { %538 = vmatprep.subr.bf16.mxu0 %v679_v0 }
  0x3a   :  { %521 = vmatpush3.bf16.msra.mxu1 %v568_v11 }
  0x3b   :  { %522 = vmatprep.subr.bf16.mxu1 %v679_v0 }
  0x3c   :  { %539 = vmatpush3.bf16.msra.mxu0 %v575_v54 }
  0x3d   :  { %540 = vmatprep.subr.bf16.mxu0 %v679_v0 }
  0x3e   :  { %523 = vmatpush3.bf16.msra.mxu1 %v569_v12 }
  0x3f   :  { %524 = vmatprep.subr.bf16.mxu1 %v679_v0 }
  0x40   :  { %541 = vmatpush3.bf16.msra.mxu0 %v576_v55 }
  0x41   :  { %542 = vmatprep.subr.bf16.mxu0 %v679_v0 }
  0x42   :  { %525 = vmatpush3.bf16.msra.mxu1 %v570_v13 }
  0x43   :  { %526 = vmatprep.subr.bf16.mxu1 %v679_v0 }
  0x44   :  { %543 = vmatpush3.bf16.msra.mxu0 %v577_v56 }
  0x45   :  { %544 = vmatprep.subr.bf16.mxu0 %v679_v0 }
  0x46   :  { %527 = vmatpush3.bf16.msra.mxu1 %v571_v14 }
  0x48   :  { %545 = vmatpush3.bf16.msra.mxu0 %v578_v57 }
  0x49   :  { %546 = vmatprep.subr.bf16.mxu0 %v679_v0 }
  0x4c   :  { %547 = vmatpush3.bf16.msra.mxu0 %v579_v58 }
  0xa4   :  { %v139_v16 = vpop.permute.xlu0 %138 }
  0xa5   :  { %v145_v18 = vmul.f32 %v460_v15, %v139_v16 }
  0xef   :  { %v130_v19 = vpop.f32.mrf.mxu0 }
  0xf0   :  { %v131_v20 = vadd.f32 %v456_v17, %v130_v19 }
  0xf1   :  { %v510_v21 = vpop.f32.mrf.mxu0 }
  0xf2   :  { %v146_v22 = vadd.f32 %v145_v18, %v131_v20  ;;  %v472_v21 = vld [vmem:[#allocation5 + $0x5] ss:$0 sm:$0xff] }
  0xf3   :  { %v133_v23 = vpop.f32.mrf.mxu0 }
  0xf4   :  { %v147_v24 = vrot.slane %v146_v22, 4  ;;  %v155_v25 = vmul.f32 %v146_v22, %v146_v22  ;;  %v473_v23 = vld [vmem:[#allocation5 + $0x6] ss:$0 sm:$0xff] }
  0xf5   :  { %v511_v26 = vpop.f32.mrf.mxu0 }
  0xf6   :  { %v148_v27 = vadd.f32 %v147_v24, %v146_v22  ;;  %v156_v28 = vrot.slane %v155_v25, 4 }
  0xf8   :  { %v149_v29 = vrot.slane %v148_v27, 2  ;;  %v157_v30 = vadd.f32 %v156_v28, %v155_v25 }
  0xfa   :  { %v150_v31 = vadd.f32 %v149_v29, %v148_v27  ;;  %v158_v32 = vrot.slane %v157_v30, 2  ;;  %v474_v27 = vld [vmem:[#allocation5 + $0x7] ss:$0 sm:$0xff] }
  0xfc   :  { %v151_v33 = vrot.slane %v150_v31, 1  ;;  %v159_v34 = vadd.f32 %v158_v32, %v157_v30 }
  0xfe   :  { %v160_v35 = vrot.slane %v159_v34, 1  ;;  %v152_v36 = vadd.f32 %v151_v33, %v150_v31 }
 0x100   :  { %v161_v37 = vadd.f32 %v160_v35, %v159_v34  ;;  %v154_v38 = vmul.f32 0.125, %v152_v36 }
 0x102   :  { %v162_v39 = vmul.f32 0.125, %v161_v37  ;;  %v163_v40 = vmul.f32 %v154_v38, %v154_v38  ;;  %v165_v43 = vsub.f32 %v146_v22, %v154_v38 }
 0x104   :  { %v164_v41 = vsub.f32 %v162_v39, %v163_v40 }
 0x106   :  { %v166_v42 = vadd.f32 1e-05, %v164_v41 }
 0x108   :  { %580 = vrsqrt.f32 %v166_v42 }
 0x115   :  { %v581_v44 = vpop.eup %580 }
 0x116   :  { %v168_v46 = vmul.f32 %v581_v44, %v165_v43 }
 0x118   :  { %v173_v48 = vmul.f32 %v461_v45, %v168_v46 }
 0x11a   :  { %v178_v49 = vadd.f32 %v462_v47, %v173_v48 }
 0x11c   :  { %v179_v50 = vpack.c.bf16 %v178_v49, %v178_v49 }
 0x11e   :  { %529 = vmatmul.mubr.bf16.vlgmr.msra.gmra.mxu1 %v179_v50 }
 0x1de   :  { %v282_v60 = vpop.f32.mrf.mxu1 }
 0x1df   :  { %v283_v61 = vadd.f32 %v463_v59, %v282_v60 }
 0x1e0   :  { %v530_v62 = vpop.f32.mrf.mxu1 }
 0x1e1   :  { %v288_v63 = vrot.slane %v283_v61, 4  ;;  %v295_v1 = vmul.f32 %v283_v61, %v283_v61 }
 0x1e2   :  { %v285_v2 = vpop.f32.mrf.mxu1 }
 0x1e3   :  { %v289_v3 = vadd.f32 %v288_v63, %v283_v61  ;;  %v296_v4 = vrot.slane %v295_v1, 4 }
 0x1e4   :  { %v531_v5 = vpop.f32.mrf.mxu1 }
 0x1e5   :  { %v290_v6 = vrot.slane %v289_v3, 2  ;;  %v297_v7 = vadd.f32 %v296_v4, %v295_v1 }
 0x1e7   :  { %v291_v8 = vadd.f32 %v290_v6, %v289_v3  ;;  %v298_v9 = vrot.slane %v297_v7, 2 }
 0x1e9   :  { %v292_v10 = vrot.slane %v291_v8, 1  ;;  %v299_v11 = vadd.f32 %v298_v9, %v297_v7 }
 0x1eb   :  { %v293_v12 = vadd.f32 %v292_v10, %v291_v8  ;;  %v300_v13 = vrot.slane %v299_v11, 1 }
 0x1ed   :  { %v294_v0 = vmul.f32 0.125, %v293_v12  ;;  %v301_v14 = vadd.f32 %v300_v13, %v299_v11 }
 0x1ef   :  { %v302_v15 = vmul.f32 0.125, %v301_v14  ;;  %v303_v16 = vmul.f32 %v294_v0, %v294_v0  ;;  %v305_v19 = vsub.f32 %v283_v61, %v294_v0 }
 0x1f1   :  { %v304_v17 = vsub.f32 %v302_v15, %v303_v16 }
 0x1f3   :  { %v306_v18 = vadd.f32 1e-05, %v304_v17 }
 0x1f5   :  { %582 = vrsqrt.f32 %v306_v18 }
 0x202   :  { %v583_v20 = vpop.eup %582 }
 0x203   :  { %v308_v22 = vmul.f32 %v583_v20, %v305_v19 }
 0x205   :  { %v313_v24 = vmul.f32 %v472_v21, %v308_v22 }
 0x207   :  { %v318_v25 = vadd.f32 %v473_v23, %v313_v24 }
 0x209   :  { %v319_v26 = vpack.c.bf16 %v318_v25, %v318_v25 }
 0x20b   :  { %549 = vmatmul.mubr.bf16.vlgmr.msra.gmra.mxu0 %v319_v26 }
 0x2cb   :  { %v423_v28 = vpop.f32.mrf.mxu0 }
 0x2cc   :  { %v424_v29 = vadd.f32 %v474_v27, %v423_v28 }
 0x2cd   :  { %v550_v30 = vpop.f32.mrf.mxu0 }
 0x2ce   :  { %429 = vmax.xlane.f32.xlu0 %v424_v29 }
 0x2cf   :  { %v426_v31 = vpop.f32.mrf.mxu0 }
 0x2d1   :  { %v551_v32 = vpop.f32.mrf.mxu0 }
 0x357   :  { %v430_v33 = vpop.xlane.xlu0 %429 }
 0x358   :  { %v431_v34 = vsub.f32 %v424_v29, %v430_v33 }
 0x35a   :  { %v432_v35 = vmul.f32 1.442695, %v431_v34 }
 0x35c   :  { %584 = vpow2.f32 %v432_v35 }
 0x369   :  { %v585_v36 = vpop.eup %584 }
 0x36a   :  { %434 = vadd.xlane.f32.xlu1 %v585_v36 }
 0x3f3   :  { %v435_v37 = vpop.xlane.xlu1 %434 }
 0x3f4   :  { %586 = vrcp.f32 %v435_v37 }
 0x401   :  { %v587_v38 = vpop.eup %586 }
 0x402   :  { %v437_v39 = vmul.f32 %v587_v38, %v585_v36 }
 0x404   :  { %439 = vst.msk [vmem:[#allocation8] sm:$0xff] %vm438_vm2, %v437_v39 }
 0x405   :  { %659 = shalt.err (!%p656_p5)
}
 0x406   :  { %449 = dma.vmem_to_hbm [thread:$0]  %s447_s1, 128, %s760_s5, [#allocation4]  }
 0x407   :  { %672 = dma.done.wait [#allocation4], 128  }
 0x408   :  { %673 = vsyncadd [#allocation4], 4294967168 }
 0x409   :  { %453 = vsyncpa [#allocation3], 1 }
 0x40a   :  { %454 = vsyncpa [#allocation6], 1 }
 0x40b   :  { %455 = vsyncpa [#allocation4], 1 }

</bundles_post_ra>
